<compile_context>
chip_gen: v7x
topology: tpu7x:2x2x1
jax: 0.10.0
libtpu: 0.0.40
codegen_flags: <defaults>
</compile_context>

<pallas_src>
import jax
import jax.numpy as jnp
from jax.experimental import pallas as pl
from jax.experimental.pallas import tpu as pltpu

# ---------------- problem configuration (SEBolck(in=4, out=32, k=3, s=1, p=1)) -------
N, Cin, H, W = 2, 4, 16, 16          # input  (N, Cin, H, W)  == PyTorch NCHW
Cout, K, S, P = 32, 3, 1, 1
RATIO = 16
MID = Cout // RATIO                  # SE bottleneck channels
EPS = 1e-5                           # BatchNorm eps
HW = H * W
KKC = K * K * Cin                    # im2col contraction size (36)


# ---------------- single fused kernel -------------------------------------------------
def sebolck_kernel(pT_ref, wT_ref, pp_ref, sew_ref, o_ref):
    # pT_ref : (KKC, N*HW)   im2col patches, transposed (lanes = pixels)
    # wT_ref : (Cout, KKC)   conv weight, taps flattened as (kh, kw, cin)
    # pp_ref : (Cout, 8)     packed per-channel params:
    #                        col0=conv bias, col1=gamma, col2=beta,
    #                        col3=SE compress bias (zero padded), col4=SE excitation bias
    # sew_ref: (2*Cout, Cout) rows 0:Cout = w1^T zero-padded, rows Cout: = w2^T zero-padded
    # o_ref  : (N, Cout, HW)  lane-dense output (already NCHW-ordered pixels)
    pp = pp_ref[...]

    # --- conv 3x3 + bias as ONE im2col matmul on the MXU (lane-dense result) ---
    yT = jnp.dot(wT_ref[...], pT_ref[...],
                 preferred_element_type=jnp.float32)              # (Cout, N*HW)
    yT = yT + pp[:, 0:1]                                          # + conv bias

    # --- BatchNorm (training mode: biased batch stats over N,H,W), centered variance ---
    inv_cnt = 1.0 / float(N * HW)
    mean = jnp.sum(yT, axis=1, keepdims=True) * inv_cnt           # (Cout, 1)
    d = yT - mean
    var = jnp.sum(d * d, axis=1, keepdims=True) * inv_cnt
    scale = pp[:, 1:2] * jax.lax.rsqrt(var + EPS)                 # gamma * invstd
    a = jnp.maximum(d * scale + pp[:, 2:3], 0.0)                  # + beta, ReLU

    # --- SE: squeeze / compress+ReLU / excitation / softmax over channels / scale ---
    w1pT = sew_ref[0:Cout, :]                                     # (Cout, Cout), rows>=MID are 0
    w2pT = sew_ref[Cout:2 * Cout, :]                              # (Cout, Cout), cols>=MID are 0
    b1c = pp[:, 3:4]                                              # (Cout, 1), rows>=MID are 0
    b2c = pp[:, 4:5]                                              # (Cout, 1)
    inv_hw = 1.0 / float(HW)

    for n in range(N):                                            # static unroll, N=2
        an = a[:, n * HW:(n + 1) * HW]                            # (Cout, HW), 128-aligned slice
        # squeeze: global average pool over H, W
        pooled = jnp.sum(an, axis=1, keepdims=True) * inv_hw      # (Cout, 1)
        # compress (1x1 conv) + ReLU; zero-padded rows stay exactly 0
        h = jnp.maximum(
            jnp.dot(w1pT, pooled, preferred_element_type=jnp.float32) + b1c, 0.0)
        # excitation (1x1 conv)
        e = jnp.dot(w2pT, h, preferred_element_type=jnp.float32) + b2c
        # F.softmax with dim=None on a 4D tensor -> softmax over the channel dim
        ex = jnp.exp(e - jnp.max(e, axis=0, keepdims=True))
        sm = ex * pl.reciprocal(jnp.sum(ex, axis=0, keepdims=True), approx=False)
        o_ref[n] = (an * sm).astype(o_ref.dtype)


# ---------------- wrapper --------------------------------------------------------------
def se_block_forward(x_nchw, params):
    w_hwio, b_conv, gamma, beta, w1, b1, w2, b2 = params
    x = x_nchw.astype(jnp.float32)

    # im2col (transposed) -- tiny one-off XLA glue on ~10 KiB of data
    xp = jnp.pad(x, ((0, 0), (0, 0), (P, P), (P, P)))                   # (N, Cin, Hp, Wp)
    cols = [xp[:, :, kh:kh + H, kw:kw + W] for kh in range(K) for kw in range(K)]
    pT = jnp.transpose(jnp.stack(cols, axis=0), (0, 2, 1, 3, 4))        # (K*K, Cin, N, H, W)
    pT = pT.reshape(KKC, N * HW)                                        # (36, 512)

    # conv weight with taps flattened as (kh, kw, cin) to match pT row ordering
    wT = jnp.transpose(w_hwio, (3, 0, 1, 2)).reshape(Cout, KKC)         # (32, 36)

    # pack tiny per-channel operands into a single (Cout, 8) matrix
    b1_pad = jnp.zeros((Cout,), jnp.float32).at[:MID].set(b1)
    zeros = jnp.zeros((Cout,), jnp.float32)
    pp = jnp.stack([b_conv, gamma, beta, b1_pad, b2, zeros, zeros, zeros], axis=1)

    # pack SE 1x1 convs, zero-padded to Cout so every in-kernel op stays 32-lane wide
    w1pT = jnp.zeros((Cout, Cout), jnp.float32).at[:MID, :].set(w1.T)
    w2pT = jnp.zeros((Cout, Cout), jnp.float32).at[:, :MID].set(w2.T)
    sew = jnp.concatenate([w1pT, w2pT], axis=0)                         # (64, 32)

    out = pl.pallas_call(
        sebolck_kernel,
        grid=(1,),
        in_specs=[
            pl.BlockSpec((KKC, N * HW), lambda i: (0, 0)),
            pl.BlockSpec((Cout, KKC), lambda i: (0, 0)),
            pl.BlockSpec((Cout, 8), lambda i: (0, 0)),
            pl.BlockSpec((2 * Cout, Cout), lambda i: (0, 0)),
        ],
        out_specs=pl.BlockSpec((N, Cout, HW), lambda i: (0, 0, 0)),
        out_shape=jax.ShapeDtypeStruct((N, Cout, HW), jnp.float32),
        compiler_params=pltpu.CompilerParams(dimension_semantics=("arbitrary",)),
    )(pT, wT, pp, sew)

    # output is already channel-major per image; just reshape to NCHW
    return out.reshape(N, Cout, H, W)


# ---------------- pure-JAX reference ----------------------------------------------------
def reference(x_nchw, params):
    w_hwio, b_conv, gamma, beta, w1, b1, w2, b2 = params
    with jax.default_matmul_precision("highest"):
        w_oihw = jnp.transpose(w_hwio, (3, 2, 0, 1))
        y = jax.lax.conv_general_dilated(
            x_nchw, w_oihw, (S, S), [(P, P), (P, P)],
            dimension_numbers=("NCHW", "OIHW", "NCHW")) + b_conv[None, :, None, None]
        mean = y.mean(axis=(0, 2, 3))
        var = y.var(axis=(0, 2, 3))
        yn = (y - mean[None, :, None, None]) * jax.lax.rsqrt(var + EPS)[None, :, None, None]
        yn = yn * gamma[None, :, None, None] + beta[None, :, None, None]
        a = jnp.maximum(yn, 0.0)
        pooled = a.mean(axis=(2, 3))                        # (N, Cout)
        h = jnp.maximum(pooled @ w1 + b1[None, :], 0.0)     # (N, MID)
        e = h @ w2 + b2[None, :]                            # (N, Cout)
        sm = jax.nn.softmax(e, axis=1)                      # F.softmax -> dim=1 for 4D
        return a * sm[:, :, None, None]


if __name__ == "__main__":
    key = jax.random.PRNGKey(0)
    ks = jax.random.split(key, 9)

    # deterministic synthetic parameters (shapes from the module's __init__)
    w_hwio = jax.random.normal(ks[0], (K, K, Cin, Cout), jnp.float32) * 0.1
    b_conv = jax.random.normal(ks[1], (Cout,), jnp.float32) * 0.1
    gamma  = 1.0 + 0.1 * jax.random.normal(ks[2], (Cout,), jnp.float32)
    beta   = 0.1 * jax.random.normal(ks[3], (Cout,), jnp.float32)
    w1     = jax.random.normal(ks[4], (Cout, MID), jnp.float32) * 0.1   # compress 1x1
    b1     = jax.random.normal(ks[5], (MID,), jnp.float32) * 0.1
    w2     = jax.random.normal(ks[6], (MID, Cout), jnp.float32) * 0.1   # excitation 1x1
    b2     = jax.random.normal(ks[7], (Cout,), jnp.float32) * 0.1
    params = (w_hwio, b_conv, gamma, beta, w1, b1, w2, b2)

    x = jax.random.normal(ks[8], (N, Cin, H, W), jnp.float32)

    fwd = jax.jit(se_block_forward)
    out = jax.block_until_ready(fwd(x, params))
    ref = jax.block_until_ready(reference(x, params))

    assert out.shape == (N, Cout, H, W)
    max_err = jnp.max(jnp.abs(out - ref))
    assert jnp.allclose(out, ref, rtol=1e-3, atol=1e-3), f"mismatch vs reference (max abs err {max_err})"
    print("KERNEL_OK")
</pallas_src>

<mosaic_0001>
module attributes {stable_mosaic.version = 11 : i64} {
  func.func @sebolck_kernel(%arg0: i32, %arg1: memref<36x512xf32, #tpu.memory_space<vmem>>, %arg2: memref<32x36xf32, #tpu.memory_space<vmem>>, %arg3: memref<32x8xf32, #tpu.memory_space<vmem>>, %arg4: memref<64x32xf32, #tpu.memory_space<vmem>>, %arg5: memref<2x32x256xf32, #tpu.memory_space<vmem>>) attributes {dimension_semantics = [#tpu.dimension_semantics<arbitrary>], iteration_bounds = array<i64: 1>, scalar_prefetch = 0 : i64, scratch_operands = 0 : i64, tpu.core_type = #tpu.core_type<tc>, window_params = [{pipeline_mode = #tpu.pipeline_mode<synchronous>, transform_indices = @transform_0, window_bounds = array<i64: 36, 512>}, {pipeline_mode = #tpu.pipeline_mode<synchronous>, transform_indices = @transform_1, window_bounds = array<i64: 32, 36>}, {pipeline_mode = #tpu.pipeline_mode<synchronous>, transform_indices = @transform_2, window_bounds = array<i64: 32, 8>}, {pipeline_mode = #tpu.pipeline_mode<synchronous>, transform_indices = @transform_3, window_bounds = array<i64: 64, 32>}, {pipeline_mode = #tpu.pipeline_mode<synchronous>, transform_indices = @transform_4, window_bounds = array<i64: 2, 32, 256>}]} {
    %c0 = arith.constant 0 : index
    %c0_0 = arith.constant 0 : index
    %0 = vector.load %arg3[%c0, %c0_0] : memref<32x8xf32, #tpu.memory_space<vmem>>, vector<32x8xf32>
    %c0_1 = arith.constant 0 : index
    %c0_2 = arith.constant 0 : index
    %1 = vector.load %arg2[%c0_1, %c0_2] : memref<32x36xf32, #tpu.memory_space<vmem>>, vector<32x36xf32>
    %c0_3 = arith.constant 0 : index
    %c0_4 = arith.constant 0 : index
    %2 = vector.load %arg1[%c0_3, %c0_4] : memref<36x512xf32, #tpu.memory_space<vmem>>, vector<36x512xf32>
    %cst = arith.constant dense<0.000000e+00> : vector<32x512xf32>
    %3 = tpu.matmul %1, %2, %cst {dimension_numbers = #tpu.dot_dimension_numbers<[1], [0], [0], [1], [0, 0, 1, 1], [], []>} : vector<32x36xf32>, vector<36x512xf32>, vector<32x512xf32> -> vector<32x512xf32>
    %4 = vector.extract_strided_slice %0 {offsets = [0, 0], sizes = [32, 1], strides = [1, 1]} : vector<32x8xf32> to vector<32x1xf32>
    %5 = vector.broadcast %4 : vector<32x1xf32> to vector<32x512xf32>
    %6 = arith.addf %3, %5 : vector<32x512xf32>
    %cst_5 = arith.constant dense<0.000000e+00> : vector<32xf32>
    %7 = vector.multi_reduction <add>, %6, %cst_5 [1] : vector<32x512xf32> to vector<32xf32>
    %8 = vector.shape_cast %7 : vector<32xf32> to vector<32x1xf32>
    %cst_6 = arith.constant 0.001953125 : f32
    %9 = vector.broadcast %cst_6 : f32 to vector<32x1xf32>
    %10 = arith.mulf %8, %9 : vector<32x1xf32>
    %11 = vector.broadcast %10 : vector<32x1xf32> to vector<32x512xf32>
    %12 = arith.subf %6, %11 : vector<32x512xf32>
    %13 = arith.mulf %12, %12 : vector<32x512xf32>
    %cst_7 = arith.constant dense<0.000000e+00> : vector<32xf32>
    %14 = vector.multi_reduction <add>, %13, %cst_7 [1] : vector<32x512xf32> to vector<32xf32>
    %15 = vector.shape_cast %14 : vector<32xf32> to vector<32x1xf32>
    %cst_8 = arith.constant 0.001953125 : f32
    %16 = vector.broadcast %cst_8 : f32 to vector<32x1xf32>
    %17 = arith.mulf %15, %16 : vector<32x1xf32>
    %18 = vector.extract_strided_slice %0 {offsets = [0, 1], sizes = [32, 1], strides = [1, 1]} : vector<32x8xf32> to vector<32x1xf32>
    %cst_9 = arith.constant 9.99999974E-6 : f32
    %19 = vector.broadcast %cst_9 : f32 to vector<32x1xf32>
    %20 = arith.addf %17, %19 : vector<32x1xf32>
    %21 = math.rsqrt %20 : vector<32x1xf32>
    %22 = arith.mulf %18, %21 : vector<32x1xf32>
    %23 = vector.broadcast %22 : vector<32x1xf32> to vector<32x512xf32>
    %24 = arith.mulf %12, %23 : vector<32x512xf32>
    %25 = vector.extract_strided_slice %0 {offsets = [0, 2], sizes = [32, 1], strides = [1, 1]} : vector<32x8xf32> to vector<32x1xf32>
    %26 = vector.broadcast %25 : vector<32x1xf32> to vector<32x512xf32>
    %27 = arith.addf %24, %26 : vector<32x512xf32>
    %cst_10 = arith.constant 0.000000e+00 : f32
    %28 = vector.broadcast %cst_10 : f32 to vector<32x512xf32>
    %29 = arith.maximumf %27, %28 : vector<32x512xf32>
    %c0_11 = arith.constant 0 : index
    %c0_12 = arith.constant 0 : index
    %30 = vector.load %arg4[%c0_11, %c0_12] : memref<64x32xf32, #tpu.memory_space<vmem>>, vector<32x32xf32>
    %c32 = arith.constant 32 : index
    %c0_13 = arith.constant 0 : index
    %31 = vector.load %arg4[%c32, %c0_13] : memref<64x32xf32, #tpu.memory_space<vmem>>, vector<32x32xf32>
    %32 = vector.extract_strided_slice %0 {offsets = [0, 3], sizes = [32, 1], strides = [1, 1]} : vector<32x8xf32> to vector<32x1xf32>
    %33 = vector.extract_strided_slice %0 {offsets = [0, 4], sizes = [32, 1], strides = [1, 1]} : vector<32x8xf32> to vector<32x1xf32>
    %34 = vector.extract_strided_slice %29 {offsets = [0, 0], sizes = [32, 256], strides = [1, 1]} : vector<32x512xf32> to vector<32x256xf32>
    %cst_14 = arith.constant dense<0.000000e+00> : vector<32xf32>
    %35 = vector.multi_reduction <add>, %34, %cst_14 [1] : vector<32x256xf32> to vector<32xf32>
    %36 = vector.shape_cast %35 : vector<32xf32> to vector<32x1xf32>
    %cst_15 = arith.constant 3.906250e-03 : f32
    %37 = vector.broadcast %cst_15 : f32 to vector<32x1xf32>
    %38 = arith.mulf %36, %37 : vector<32x1xf32>
    %cst_16 = arith.constant dense<0.000000e+00> : vector<32x1xf32>
    %39 = tpu.matmul %30, %38, %cst_16 {dimension_numbers = #tpu.dot_dimension_numbers<[1], [0], [0], [1], [0, 0, 1, 1], [], []>} : vector<32x32xf32>, vector<32x1xf32>, vector<32x1xf32> -> vector<32x1xf32>
    %40 = arith.addf %39, %32 : vector<32x1xf32>
    %cst_17 = arith.constant 0.000000e+00 : f32
    %41 = vector.broadcast %cst_17 : f32 to vector<32x1xf32>
    %42 = arith.maximumf %40, %41 : vector<32x1xf32>
    %cst_18 = arith.constant dense<0.000000e+00> : vector<32x1xf32>
    %43 = tpu.matmul %31, %42, %cst_18 {dimension_numbers = #tpu.dot_dimension_numbers<[1], [0], [0], [1], [0, 0, 1, 1], [], []>} : vector<32x32xf32>, vector<32x1xf32>, vector<32x1xf32> -> vector<32x1xf32>
    %44 = arith.addf %43, %33 : vector<32x1xf32>
    %cst_19 = arith.constant dense<0xFF800000> : vector<1xf32>
    %45 = vector.multi_reduction <maximumf>, %44, %cst_19 [0] : vector<32x1xf32> to vector<1xf32>
    %46 = vector.shape_cast %45 : vector<1xf32> to vector<1x1xf32>
    %47 = vector.broadcast %46 : vector<1x1xf32> to vector<32x1xf32>
    %48 = arith.subf %44, %47 : vector<32x1xf32>
    %49 = math.exp %48 : vector<32x1xf32>
    %cst_20 = arith.constant dense<0.000000e+00> : vector<1xf32>
    %50 = vector.multi_reduction <add>, %49, %cst_20 [0] : vector<32x1xf32> to vector<1xf32>
    %51 = vector.shape_cast %50 : vector<1xf32> to vector<1x1xf32>
    %52 = tpu.reciprocal %51 : vector<1x1xf32> -> vector<1x1xf32>
    %53 = vector.broadcast %52 : vector<1x1xf32> to vector<32x1xf32>
    %54 = arith.mulf %49, %53 : vector<32x1xf32>
    %55 = vector.broadcast %54 : vector<32x1xf32> to vector<32x256xf32>
    %56 = arith.mulf %34, %55 : vector<32x256xf32>
    %c0_21 = arith.constant 0 : index
    %c0_22 = arith.constant 0 : index
    %c0_23 = arith.constant 0 : index
    %57 = vector.load %arg5[%c0_21, %c0_22, %c0_23] : memref<2x32x256xf32, #tpu.memory_space<vmem>>, vector<1x32x256xf32>
    %58 = vector.shape_cast %57 : vector<1x32x256xf32> to vector<32x256xf32>
    %59 = vector.shape_cast %56 : vector<32x256xf32> to vector<1x32x256xf32>
    tpu.vector_store %arg5[%c0_21, %c0_22, %c0_23], %59 {strides = array<i32>} : memref<2x32x256xf32, #tpu.memory_space<vmem>>, vector<1x32x256xf32>,
    %60 = vector.extract_strided_slice %29 {offsets = [0, 256], sizes = [32, 256], strides = [1, 1]} : vector<32x512xf32> to vector<32x256xf32>
    %cst_24 = arith.constant dense<0.000000e+00> : vector<32xf32>
    %61 = vector.multi_reduction <add>, %60, %cst_24 [1] : vector<32x256xf32> to vector<32xf32>
    %62 = vector.shape_cast %61 : vector<32xf32> to vector<32x1xf32>
    %cst_25 = arith.constant 3.906250e-03 : f32
    %63 = vector.broadcast %cst_25 : f32 to vector<32x1xf32>
    %64 = arith.mulf %62, %63 : vector<32x1xf32>
    %cst_26 = arith.constant dense<0.000000e+00> : vector<32x1xf32>
    %65 = tpu.matmul %30, %64, %cst_26 {dimension_numbers = #tpu.dot_dimension_numbers<[1], [0], [0], [1], [0, 0, 1, 1], [], []>} : vector<32x32xf32>, vector<32x1xf32>, vector<32x1xf32> -> vector<32x1xf32>
    %66 = arith.addf %65, %32 : vector<32x1xf32>
    %cst_27 = arith.constant 0.000000e+00 : f32
    %67 = vector.broadcast %cst_27 : f32 to vector<32x1xf32>
    %68 = arith.maximumf %66, %67 : vector<32x1xf32>
    %cst_28 = arith.constant dense<0.000000e+00> : vector<32x1xf32>
    %69 = tpu.matmul %31, %68, %cst_28 {dimension_numbers = #tpu.dot_dimension_numbers<[1], [0], [0], [1], [0, 0, 1, 1], [], []>} : vector<32x32xf32>, vector<32x1xf32>, vector<32x1xf32> -> vector<32x1xf32>
    %70 = arith.addf %69, %33 : vector<32x1xf32>
    %cst_29 = arith.constant dense<0xFF800000> : vector<1xf32>
    %71 = vector.multi_reduction <maximumf>, %70, %cst_29 [0] : vector<32x1xf32> to vector<1xf32>
    %72 = vector.shape_cast %71 : vector<1xf32> to vector<1x1xf32>
    %73 = vector.broadcast %72 : vector<1x1xf32> to vector<32x1xf32>
    %74 = arith.subf %70, %73 : vector<32x1xf32>
    %75 = math.exp %74 : vector<32x1xf32>
    %cst_30 = arith.constant dense<0.000000e+00> : vector<1xf32>
    %76 = vector.multi_reduction <add>, %75, %cst_30 [0] : vector<32x1xf32> to vector<1xf32>
    %77 = vector.shape_cast %76 : vector<1xf32> to vector<1x1xf32>
    %78 = tpu.reciprocal %77 : vector<1x1xf32> -> vector<1x1xf32>
    %79 = vector.broadcast %78 : vector<1x1xf32> to vector<32x1xf32>
    %80 = arith.mulf %75, %79 : vector<32x1xf32>
    %81 = vector.broadcast %80 : vector<32x1xf32> to vector<32x256xf32>
    %82 = arith.mulf %60, %81 : vector<32x256xf32>
    %c1 = arith.constant 1 : index
    %c0_31 = arith.constant 0 : index
    %c0_32 = arith.constant 0 : index
    %83 = vector.load %arg5[%c1, %c0_31, %c0_32] : memref<2x32x256xf32, #tpu.memory_space<vmem>>, vector<1x32x256xf32>
    %84 = vector.shape_cast %83 : vector<1x32x256xf32> to vector<32x256xf32>
    %85 = vector.shape_cast %82 : vector<32x256xf32> to vector<1x32x256xf32>
    tpu.vector_store %arg5[%c1, %c0_31, %c0_32], %85 {strides = array<i32>} : memref<2x32x256xf32, #tpu.memory_space<vmem>>, vector<1x32x256xf32>,
    return
  }
  func.func @transform_0(%arg0: i32) -> (i32, i32) {
    %c0_i32 = arith.constant 0 : i32
    %c0_i32_0 = arith.constant 0 : i32
    %c0_i32_1 = arith.constant 0 : i32
    return %c0_i32, %c0_i32_0 : i32, i32
  }
  func.func @transform_1(%arg0: i32) -> (i32, i32) {
    %c0_i32 = arith.constant 0 : i32
    %c0_i32_0 = arith.constant 0 : i32
    %c0_i32_1 = arith.constant 0 : i32
    return %c0_i32, %c0_i32_0 : i32, i32
  }
  func.func @transform_2(%arg0: i32) -> (i32, i32) {
    %c0_i32 = arith.constant 0 : i32
    %c0_i32_0 = arith.constant 0 : i32
    %c0_i32_1 = arith.constant 0 : i32
    return %c0_i32, %c0_i32_0 : i32, i32
  }
  func.func @transform_3(%arg0: i32) -> (i32, i32) {
    %c0_i32 = arith.constant 0 : i32
    %c0_i32_0 = arith.constant 0 : i32
    %c0_i32_1 = arith.constant 0 : i32
    return %c0_i32, %c0_i32_0 : i32, i32
  }
  func.func @transform_4(%arg0: i32) -> (i32, i32, i32) {
    %c0_i32 = arith.constant 0 : i32
    %c0_i32_0 = arith.constant 0 : i32
    %c0_i32_1 = arith.constant 0 : i32
    %c0_i32_2 = arith.constant 0 : i32
    return %c0_i32, %c0_i32_0, %c0_i32_1 : i32, i32, i32
  }
}

</mosaic_0001>

<bundles_post_ra>
// kernel: se_block_forward.1
= control target key start
LH: loop header
LB: loop body
LE: loop exit
PB: predicated region body
PF: predicated region fallthrough
CT: control target
= control target key end

     0   :  { %v1261_v3 = vmov 0.0   ;;  %v1262_v8 = vmov 0   ;;  %vm78_vm0 = vcmask 1043456   ;;  %vm65_vm1 = vcmask 293888   ;;  %s1265_s18 = smov 125   ;;  %s1266_s27 = smov 124   ;;  %s1724_s0 = inlined_call_operand.vmem [shape: f32[36,512], index: 0, kind: input, shape index: {}]   ;;  %s1725_s2 = inlined_call_operand.vmem [shape: f32[32,8], index: 2, kind: input, shape index: {}]   ;;  %s1726_s1 = inlined_call_operand.vmem [shape: f32[32,36], index: 1, kind: input, shape index: {}]   ;;  %s1727_s3 = inlined_call_operand.vmem [shape: f32[64,32], index: 3, kind: input, shape index: {}]   ;;  %s1728_s4 = inlined_call_operand.vmem [shape: f32[2,32,256], index: 4, kind: output, shape index: {}]  }
   0x1   :  { %v26_v0 = vld [vmem:[%s1724_s0 + $0x8] sm:$0xff]  ;;  %v28_v2 = vld [vmem:[%s1724_s0 + $0x18] sm:$0xff]  ;;  %155 = vmatprep.mubr.f32.mxu0 %v1261_v3  ;;  %244 = vmatprep.mubr.f32.mxu1 %v1261_v3  ;;  %v25_v6 = vld [vmem:[%s1724_s0] sm:$0xff]  ;;  %vm481_vm2 = vcmask 261120   ;;  %vm692_vm3 = vcmask 7168  }
   0x2   :  { %v30_v1 = vld [vmem:[%s1724_s0 + $0x28] sm:$0xff]  ;;  %v32_v5 = vld [vmem:[%s1724_s0 + $0x38] sm:$0xff]  ;;  %v29_v7 = vld [vmem:[%s1724_s0 + $0x20] sm:$0xff]  ;;  %1224 = vset.pattern.permute.xlu0 %v1262_v8  ;;  %1225 = vset.pattern.permute.xlu1 %v1262_v8 }
   0x3   :  { %v1170_v4 = vpack.c.bf16 %v30_v1, %v26_v0  ;;  %v1178_v9 = vpack.c.bf16 %v32_v5, %v28_v2  ;;  %v1172_v10 = vpack.c.bf16 %v29_v7, %v25_v6  ;;  %v27_v11 = vld [vmem:[%s1724_s0 + $0x10] sm:$0xff]  ;;  %v34_v13 = vld [vmem:[%s1724_s0 + $0x48] sm:$0xff]  ;;  %v36_v16 = vld [vmem:[%s1724_s0 + $0x58] sm:$0xff] }
   0x4   :  { %v31_v12 = vld [vmem:[%s1724_s0 + $0x30] sm:$0xff]  ;;  %v38_v15 = vld [vmem:[%s1724_s0 + $0x68] sm:$0xff]  ;;  %v40_v17 = vld [vmem:[%s1724_s0 + $0x78] sm:$0xff] }
   0x5   :  { %1171 = vmatprep.subr.bf16.mxu0 %v1170_v4  ;;  %v1180_v14 = vpack.c.bf16 %v31_v12, %v27_v11  ;;  %1179 = vmatprep.subr.bf16.mxu1 %v1178_v9  ;;  %v1174_v18 = vpack.c.bf16 %v38_v15, %v34_v13  ;;  %v1182_v19 = vpack.c.bf16 %v40_v17, %v36_v16  ;;  %v33_v20 = vld [vmem:[%s1724_s0 + $0x40] sm:$0xff]  ;;  %v35_v22 = vld [vmem:[%s1724_s0 + $0x50] sm:$0xff]  ;;  %v42_v26 = vld [vmem:[%s1724_s0 + $0x88] sm:$0xf] }
   0x6   :  { %1173 = vmatpush1.bf16.msra.mxu0 %v1172_v10  ;;  %v37_v21 = vld [vmem:[%s1724_s0 + $0x60] sm:$0xff]  ;;  %v39_v24 = vld [vmem:[%s1724_s0 + $0x70] sm:$0xff]  ;;  %v44_v27 = vld [vmem:[%s1724_s0 + $0x98] sm:$0xf] }
   0x7   :  { %1181 = vmatpush1.bf16.msra.mxu1 %v1180_v14  ;;  %v1176_v23 = vpack.c.bf16 %v37_v21, %v33_v20  ;;  %1175 = vmatprep.subr.bf16.mxu0 %v1174_v18  ;;  %v1184_v25 = vpack.c.bf16 %v39_v24, %v35_v22  ;;  %v1353_v28 = vld [vmem:[%s1725_s2] sm:$0xff]  ;;  %v1358_v29 = vld [vmem:[%s1725_s2 + $0x10] sm:$0xff]  ;;  %v1377_v33 = vld [vmem:[%s1725_s2 + $0x8] sm:$0xff] }
   0x8   :  { %1183 = vmatprep.subr.bf16.mxu1 %v1182_v19  ;;  %v41_v30 = vld [vmem:[%s1724_s0 + $0x80] sm:$0xf]  ;;  %v43_v31 = vld [vmem:[%s1724_s0 + $0x90] sm:$0xf]  ;;  %47 = vperm.xlu0 %1224, %v1353_v28   ;;  %v1384_v34 = vld [vmem:[%s1725_s2 + $0x18] sm:$0xff] }
   0x9   :  { %v21_v32 = vld [vmem:[%s1726_s1] sm:$0xff]  ;;  %57 = vperm.xlu1 %1225, %v1358_v29   ;;  %v22_v35 = vld [vmem:[%s1726_s1 + $0x8] sm:$0xff]  ;;  %v23_v36 = vld [vmem:[%s1726_s1 + $0x10] sm:$0xff] }
   0xa   :  { %1177 = vmatpush1.bf16.msra.mxu0 %v1176_v23  ;;  %v24_v37 = vld [vmem:[%s1726_s1 + $0x18] sm:$0xff] }
   0xb   :  { %1185 = vmatpush1.bf16.msra.mxu1 %v1184_v25  ;;  %1046 = vmatprep.subr.msk.mxu0 %vm78_vm0, %v42_v26 }
   0xc   :  { %1052 = vmatprep.subr.msk.mxu1 %vm78_vm0, %v44_v27  ;;  %52 = vperm.xlu0 %1224, %v1377_v33  }
   0xd   :  { %62 = vperm.xlu1 %1225, %v1384_v34  }
   0xe   :  { %1047 = vmatpush1.msk.msra.mxu0 %vm78_vm0, %v41_v30 }
   0xf   :  { %1053 = vmatpush1.msk.msra.mxu1 %vm78_vm0, %v43_v31  ;;  %1048 = vmatmul.mubr.msk.f32.vlgmr.msra.gmra.mrb[0].mxu0 %vm65_vm1, %v21_v32 }
  0x10   :  { %1054 = vmatmul.mubr.msk.f32.vlgmr.msra.gmra.mrb[0].mxu1 %vm65_vm1, %v21_v32  ;;  %161 = vmatprep.mubr.f32.mxu0 %v1261_v3 }
  0x11   :  { %250 = vmatprep.mubr.f32.mxu1 %v1261_v3 }
  0x13   :  { %1049 = vmatmul.mubr.msk.f32.gmra.mrb[2].mxu0 %vm65_vm1, %v22_v35 }
  0x14   :  { %1055 = vmatmul.mubr.msk.f32.gmra.mrb[2].mxu1 %vm65_vm1, %v22_v35  ;;  %167 = vmatprep.mubr.f32.mxu0 %v1261_v3 }
  0x15   :  { %256 = vmatprep.mubr.f32.mxu1 %v1261_v3 }
  0x17   :  { %1050 = vmatmul.mubr.msk.f32.gmra.mrb[4].mxu0 %vm65_vm1, %v23_v36 }
  0x18   :  { %173 = vmatprep.mubr.f32.mxu0 %v1261_v3  ;;  %1056 = vmatmul.mubr.msk.f32.gmra.mrb[4].mxu1 %vm65_vm1, %v23_v36 }
  0x19   :  { %262 = vmatprep.mubr.f32.mxu1 %v1261_v3 }
  0x1b   :  { %1051 = vmatmul.mubr.msk.f32.gmra.mrb[6].mxu0 %vm65_vm1, %v24_v37 }
  0x1c   :  { %1057 = vmatmul.mubr.msk.f32.gmra.mrb[6].mxu1 %vm65_vm1, %v24_v37 }
  0x87   :  { %v48_v38 = vpop.permute.xlu0 %47 }
  0x88   :  { %v58_v45 = vpop.permute.xlu1 %57 }
  0x8b   :  { %v53_v47 = vpop.permute.xlu0 %52 }
  0x8c   :  { %v63_v3 = vpop.permute.xlu1 %62 }
  0xe2   :  { %v157_v39 = vpop.f32.mrb[0].mxu0 }
  0xe3   :  { %v158_v40 = vadd.f32 %v157_v39, %v48_v38  ;;  %v246_v41 = vpop.f32.mrb[0].mxu1  ;;  %v159_v42 = vpop.f32.mrb[1].mxu0 }
  0xe4   :  { %v160_v43 = vadd.f32 %v159_v42, %v48_v38  ;;  %v248_v44 = vpop.f32.mrb[1].mxu1  ;;  %v247_v46 = vadd.f32 %v246_v41, %v48_v38 }
  0xe5   :  { %v249_v53 = vadd.f32 %v248_v44, %v48_v38 }
  0xe6   :  { %v269_v48 = vadd.f32 %v160_v43, %v158_v40  ;;  %v163_v49 = vpop.f32.mrb[2].mxu0 }
  0xe7   :  { %v164_v50 = vadd.f32 %v163_v49, %v53_v47  ;;  %v252_v51 = vpop.f32.mrb[2].mxu1  ;;  %v165_v52 = vpop.f32.mrb[3].mxu0 }
  0xe8   :  { %v166_v54 = vadd.f32 %v165_v52, %v53_v47  ;;  %v254_v55 = vpop.f32.mrb[3].mxu1  ;;  %v270_v56 = vadd.f32 %v269_v48, %v247_v46  ;;  %v253_v57 = vadd.f32 %v252_v51, %v53_v47 }
  0xe9   :  { %v255_v0 = vadd.f32 %v254_v55, %v53_v47 }
  0xea   :  { %v274_v58 = vadd.f32 %v166_v54, %v164_v50  ;;  %v169_v59 = vpop.f32.mrb[4].mxu0  ;;  %v271_v60 = vadd.f32 %v270_v56, %v249_v53 }
  0xeb   :  { %v170_v61 = vadd.f32 %v169_v59, %v58_v45  ;;  %v171_v62 = vpop.f32.mrb[5].mxu0  ;;  %v258_v63 = vpop.f32.mrb[4].mxu1 }
  0xec   :  { %v172_v1 = vadd.f32 %v171_v62, %v58_v45  ;;  %272 = vadd.xlane.f32.xlu0 %v271_v60  ;;  %v259_v2 = vadd.f32 %v258_v63, %v58_v45  ;;  %v260_v4 = vpop.f32.mrb[5].mxu1  ;;  %v275_v5 = vadd.f32 %v274_v58, %v253_v57 }
  0xed   :  { %v261_v9 = vadd.f32 %v260_v4, %v58_v45 }
  0xee   :  { %v279_v6 = vadd.f32 %v172_v1, %v170_v61  ;;  %v175_v7 = vpop.f32.mrb[6].mxu0  ;;  %v276_v10 = vadd.f32 %v275_v5, %v255_v0 }
  0xef   :  { %v176_v11 = vadd.f32 %v175_v7, %v63_v3  ;;  %v177_v12 = vpop.f32.mrb[7].mxu0  ;;  %v264_v13 = vpop.f32.mrb[6].mxu1 }
  0xf0   :  { %v280_v14 = vadd.f32 %v279_v6, %v259_v2  ;;  %v178_v15 = vadd.f32 %v177_v12, %v63_v3  ;;  %277 = vadd.xlane.f32.xlu1 %v276_v10  ;;  %v265_v16 = vadd.f32 %v264_v13, %v63_v3  ;;  %v266_v17 = vpop.f32.mrb[7].mxu1 }
  0xf1   :  { %v267_v19 = vadd.f32 %v266_v17, %v63_v3 }
  0xf2   :  { %v284_v18 = vadd.f32 %v178_v15, %v176_v11  ;;  %v281_v20 = vadd.f32 %v280_v14, %v261_v9 }
  0xf4   :  { %v285_v21 = vadd.f32 %v284_v18, %v265_v16  ;;  %282 = vadd.xlane.f32.xlu0 %v281_v20 }
  0xf6   :  { %v286_v22 = vadd.f32 %v285_v21, %v267_v19 }
  0xf8   :  { %287 = vadd.xlane.f32.xlu0 %v286_v22 }
 0x179   :  { %v273_v23 = vpop.xlane.xlu0 %272 }
 0x17a   :  { %v289_v24 = vmul.f32 0.001953125, %v273_v23 }
 0x17c   :  { %v1410_v25 = vsub.f32 %v158_v40, %v289_v24  ;;  %v1412_v26 = vsub.f32 %v160_v43, %v289_v24  ;;  %v1414_v27 = vsub.f32 %v247_v46, %v289_v24  ;;  %v1416_v31 = vsub.f32 %v249_v53, %v289_v24 }
 0x17d   :  { %v278_v30 = vpop.xlane.xlu1 %277 }
 0x17e   :  { %v290_v32 = vmul.f32 0.001953125, %v278_v30  ;;  %v309_v35 = vmul.f32 %v1410_v25, %v1410_v25  ;;  %v310_v36 = vmul.f32 %v1412_v26, %v1412_v26  ;;  %v311_v37 = vmul.f32 %v1414_v27, %v1414_v27 }
 0x17f   :  { %v312_v43 = vmul.f32 %v1416_v31, %v1416_v31 }
 0x180   :  { %v1424_v38 = vsub.f32 %v164_v50, %v290_v32  ;;  %v1426_v39 = vsub.f32 %v166_v54, %v290_v32  ;;  %v325_v40 = vadd.f32 %v310_v36, %v309_v35  ;;  %v1428_v41 = vsub.f32 %v253_v57, %v290_v32 }
 0x181   :  { %v283_v42 = vpop.xlane.xlu0 %282  ;;  %v1432_v44 = vsub.f32 %v255_v0, %v290_v32 }
 0x182   :  { %v291_v45 = vmul.f32 0.001953125, %v283_v42  ;;  %v326_v46 = vadd.f32 %v325_v40, %v311_v37  ;;  %v313_v47 = vmul.f32 %v1424_v38, %v1424_v38  ;;  %v314_v48 = vmul.f32 %v1426_v39, %v1426_v39 }
 0x183   :  { %v315_v49 = vmul.f32 %v1428_v41, %v1428_v41  ;;  %v316_v55 = vmul.f32 %v1432_v44, %v1432_v44 }
 0x184   :  { %v1440_v50 = vsub.f32 %v170_v61, %v291_v45  ;;  %v1442_v51 = vsub.f32 %v172_v1, %v291_v45  ;;  %v327_v52 = vadd.f32 %v326_v46, %v312_v43  ;;  %v330_v53 = vadd.f32 %v314_v48, %v313_v47 }
 0x185   :  { %v288_v54 = vpop.xlane.xlu0 %287  ;;  %v1446_v56 = vsub.f32 %v259_v2, %v291_v45  ;;  %v1448_v57 = vsub.f32 %v261_v9, %v291_v45  ;;  %v1264_v45 = vmov 2  }
 0x186   :  { %v292_v58 = vmul.f32 0.001953125, %v288_v54  ;;  %328 = vadd.xlane.f32.xlu1 %v327_v52  ;;  %v331_v59 = vadd.f32 %v330_v53, %v315_v49  ;;  %v317_v60 = vmul.f32 %v1440_v50, %v1440_v50  ;;  %v318_v61 = vmul.f32 %v1442_v51, %v1442_v51 }
 0x187   :  { %v319_v62 = vmul.f32 %v1446_v56, %v1446_v56  ;;  %v320_v3 = vmul.f32 %v1448_v57, %v1448_v57 }
 0x188   :  { %v1456_v63 = vsub.f32 %v176_v11, %v292_v58  ;;  %v1458_v0 = vsub.f32 %v178_v15, %v292_v58  ;;  %v332_v1 = vadd.f32 %v331_v59, %v316_v55  ;;  %v335_v2 = vadd.f32 %v318_v61, %v317_v60 }
 0x189   :  { %v1462_v4 = vsub.f32 %v265_v16, %v292_v58  ;;  %v1464_v6 = vsub.f32 %v267_v19, %v292_v58  ;;  %v1263_v16 = vmov 1  }
 0x18a   :  { %333 = vadd.xlane.f32.xlu0 %v332_v1  ;;  %v336_v5 = vadd.f32 %v335_v2, %v319_v62  ;;  %v321_v7 = vmul.f32 %v1456_v63, %v1456_v63  ;;  %v322_v9 = vmul.f32 %v1458_v0, %v1458_v0  ;;  %1226 = vset.pattern.permute.xlu1 %v1263_v16 }
 0x18b   :  { %v323_v11 = vmul.f32 %v1462_v4, %v1462_v4  ;;  %v324_v13 = vmul.f32 %v1464_v6, %v1464_v6  ;;  %1227 = vset.pattern.permute.xlu0 %v1263_v16 }
 0x18c   :  { %v337_v10 = vadd.f32 %v336_v5, %v320_v3  ;;  %v340_v12 = vadd.f32 %v322_v9, %v321_v7 }
 0x18e   :  { %338 = vadd.xlane.f32.xlu1 %v337_v10  ;;  %v341_v14 = vadd.f32 %v340_v12, %v323_v11 }
 0x190   :  { %v342_v15 = vadd.f32 %v341_v14, %v324_v13 }
 0x192   :  { %343 = vadd.xlane.f32.xlu0 %v342_v15 }
 0x213   :  { %v329_v17 = vpop.xlane.xlu1 %328 }
 0x214   :  { %v345_v18 = vmul.f32 0.001953125, %v329_v17 }
 0x216   :  { %v349_v19 = vadd.f32 1e-05, %v345_v18 }
 0x217   :  { %v334_v20 = vpop.xlane.xlu0 %333 }
 0x218   :  { %1233 = vrsqrt.f32 %v349_v19  ;;  %v346_v21 = vmul.f32 0.001953125, %v334_v20 }
 0x21a   :  { %v350_v22 = vadd.f32 1e-05, %v346_v21 }
 0x21b   :  { %v339_v23 = vpop.xlane.xlu1 %338 }
 0x21c   :  { %1235 = vrsqrt.f32 %v350_v22  ;;  %v347_v24 = vmul.f32 0.001953125, %v339_v23 }
 0x21e   :  { %v351_v36 = vadd.f32 1e-05, %v347_v24 }
 0x21f   :  { %v344_v30 = vpop.xlane.xlu0 %343 }
 0x220   :  { %v348_v37 = vmul.f32 0.001953125, %v344_v30  ;;  %1237 = vrsqrt.f32 %v351_v36 }
 0x222   :  { %v1234_v32 = vpop.eup %1233  ;;  %v352_v43 = vadd.f32 1e-05, %v348_v37 }
 0x223   :  { %v357_v35 = vmul.f32 %v1234_v32, %v1353_v28 }
 0x224   :  { %1239 = vrsqrt.f32 %v352_v43 }
 0x225   :  { %363 = vperm.xlu1 %1226, %v357_v35  }
 0x226   :  { %v1236_v40 = vpop.eup %1235 }
 0x227   :  { %v358_v42 = vmul.f32 %v1236_v40, %v1377_v33 }
 0x229   :  { %1228 = vset.pattern.permute.xlu1 %v1264_v45  ;;  %368 = vperm.xlu0 %1227, %v358_v42  }
 0x22a   :  { %398 = vperm.xlu1 %1228, %v1353_v28   ;;  %v1238_v46 = vpop.eup %1237 }
 0x22b   :  { %v359_v47 = vmul.f32 %v1238_v46, %v1358_v29 }
 0x22d   :  { %1231 = vset.pattern.permute.xlu0 %v1262_v8 }
 0x22e   :  { %402 = vperm.xlu1 %1228, %v1377_v33   ;;  %v1240_v48 = vpop.eup %1239 }
 0x22f   :  { %v360_v49 = vmul.f32 %v1240_v48, %v1384_v34 }
 0x232   :  { %406 = vperm.xlu1 %1228, %v1358_v29  }
 0x236   :  { %1229 = vset.pattern.permute.xlu1 %v1263_v16 }
 0x237   :  { %373 = vperm.xlu1 %1229, %v359_v47  }
 0x23b   :  { %378 = vperm.xlu1 %1229, %v360_v49  }
 0x23f   :  { %1230 = vset.pattern.permute.xlu1 %v1264_v45 }
 0x240   :  { %410 = vperm.xlu1 %1230, %v1384_v34  }
 0x244   :  { %1232 = vset.pattern.permute.xlu1 %v1262_v8 }
 0x2a4   :  { %v364_v52 = vpop.permute.xlu1 %363 }
 0x2a5   :  { %v381_v53 = vmul.f32 %v364_v52, %v1410_v25  ;;  %v382_v54 = vmul.f32 %v364_v52, %v1412_v26  ;;  %v383_v9 = vmul.f32 %v364_v52, %v1414_v27  ;;  %v384_v11 = vmul.f32 %v364_v52, %v1416_v31 }
 0x2a8   :  { %v369_v55 = vpop.permute.xlu0 %368 }
 0x2a9   :  { %v399_v58 = vpop.permute.xlu1 %398  ;;  %v385_v61 = vmul.f32 %v369_v55, %v1424_v38  ;;  %v386_v62 = vmul.f32 %v369_v55, %v1426_v39  ;;  %v387_v20 = vmul.f32 %v369_v55, %v1428_v41 }
 0x2aa   :  { %v1486_v59 = vadd.f32 %v399_v58, %v381_v53  ;;  %v1488_v60 = vadd.f32 %v399_v58, %v382_v54  ;;  %v1512_v14 = vadd.f32 %v399_v58, %v383_v9  ;;  %v1519_v18 = vadd.f32 %v399_v58, %v384_v11  ;;  %v445_v58 = vld [vmem:[%s1727_s3] sm:$0xff] }
 0x2ab   :  { %1122 = vmatprep.mubr.msk.f32.mxu0 %vm481_vm2, %v445_v58 }
 0x2ac   :  { %v429_v1 = vmax.f32 %v1486_v59, 0.0  ;;  %v430_v2 = vmax.f32 %v1488_v60, 0.0  ;;  %v431_v21 = vmax.f32 %v1512_v14, 0.0 }
 0x2ad   :  { %v403_v8 = vpop.permute.xlu1 %402 }
 0x2ae   :  { %v453_v25 = vadd.f32 %v430_v2, %v429_v1  ;;  %v1498_v26 = vadd.f32 %v403_v8, %v385_v61  ;;  %v1500_v3 = vadd.f32 %v403_v8, %v386_v62  ;;  %v1538_v32 = vadd.f32 %v403_v8, %v387_v20 }
 0x2b0   :  { %454 = vadd.xlane.f32.xlu1 %v453_v25  ;;  %v433_v5 = vmax.f32 %v1498_v26, 0.0  ;;  %v434_v38 = vmax.f32 %v1500_v3, 0.0  ;;  %v435_v46 = vmax.f32 %v1538_v32, 0.0 }
 0x2b1   :  { %v407_v39 = vpop.permute.xlu1 %406 }
 0x2b2   :  { %v456_v7 = vadd.f32 %v434_v38, %v433_v5 }
 0x2b4   :  { %457 = vadd.xlane.f32.xlu0 %v456_v7 }
 0x2b6   :  { %v374_v10 = vpop.permute.xlu1 %373 }
 0x2b7   :  { %v389_v12 = vmul.f32 %v374_v10, %v1440_v50  ;;  %v390_v13 = vmul.f32 %v374_v10, %v1442_v51  ;;  %v391_v15 = vmul.f32 %v374_v10, %v1446_v56  ;;  %v392_v19 = vmul.f32 %v374_v10, %v1448_v57 }
 0x2b8   :  { %v388_v51 = vmul.f32 %v369_v55, %v1432_v44  ;;  %v432_v56 = vmax.f32 %v1519_v18, 0.0 }
 0x2b9   :  { %v1515_v16 = vadd.f32 %v407_v39, %v389_v12  ;;  %v1517_v17 = vadd.f32 %v407_v39, %v390_v13  ;;  %v1528_v22 = vadd.f32 %v407_v39, %v391_v15  ;;  %v1536_v57 = vadd.f32 %v407_v39, %v392_v19 }
 0x2ba   :  { %v379_v27 = vpop.permute.xlu1 %378  ;;  %v1544_v36 = vadd.f32 %v403_v8, %v388_v51  ;;  %v772_v37 = vadd.f32 %v432_v56, %v431_v21  ;;  %v446_v51 = vld [vmem:[%s1727_s3 + $0x8] sm:$0xff] }
 0x2bb   :  { %v437_v31 = vmax.f32 %v1515_v16, 0.0  ;;  %v438_v50 = vmax.f32 %v1517_v17, 0.0  ;;  %v393_v23 = vmul.f32 %v379_v27, %v1456_v63  ;;  %v394_v24 = vmul.f32 %v379_v27, %v1458_v0 }
 0x2bc   :  { %v395_v63 = vmul.f32 %v379_v27, %v1462_v4  ;;  %v396_v0 = vmul.f32 %v379_v27, %v1464_v6  ;;  %v439_v43 = vmax.f32 %v1528_v22, 0.0  ;;  %v440_v45 = vmax.f32 %v1536_v57, 0.0 }
 0x2bd   :  { %v459_v41 = vadd.f32 %v438_v50, %v437_v31  ;;  %v436_v6 = vmax.f32 %v1544_v36, 0.0 }
 0x2be   :  { %v778_v49 = vadd.f32 %v440_v45, %v439_v43 }
 0x2bf   :  { %v411_v30 = vpop.permute.xlu1 %410  ;;  %460 = vadd.xlane.f32.xlu1 %v459_v41  ;;  %v775_v52 = vadd.f32 %v436_v6, %v435_v46 }
 0x2c0   :  { %v1540_v44 = vadd.f32 %v411_v30, %v393_v23  ;;  %v1542_v35 = vadd.f32 %v411_v30, %v394_v24  ;;  %v1562_v47 = vadd.f32 %v411_v30, %v395_v63  ;;  %v1564_v48 = vadd.f32 %v411_v30, %v396_v0  ;;  %v447_v24 = vld [vmem:[%s1727_s3 + $0x10] sm:$0xff]  ;;  %v448_v0 = vld [vmem:[%s1727_s3 + $0x18] sm:$0xff] }
 0x2c2   :  { %v441_v40 = vmax.f32 %v1540_v44, 0.0  ;;  %v442_v42 = vmax.f32 %v1542_v35, 0.0  ;;  %v443_v53 = vmax.f32 %v1562_v47, 0.0  ;;  %v444_v54 = vmax.f32 %v1564_v48, 0.0 }
 0x2c3   :  { %773 = vadd.xlane.f32.xlu1 %v772_v37 }
 0x2c4   :  { %v462_v4 = vadd.f32 %v442_v42, %v441_v40  ;;  %v781_v55 = vadd.f32 %v444_v54, %v443_v53 }
 0x2c6   :  { %463 = vadd.xlane.f32.xlu0 %v462_v4  ;;  %v449_v4 = vld [vmem:[%s1727_s3 + $0x20] sm:$0xff] }
 0x2c7   :  { %779 = vadd.xlane.f32.xlu1 %v778_v49  ;;  %1136 = vmatprep.mubr.msk.f32.mxu1 %vm481_vm2, %v449_v4 }
 0x2ca   :  { %776 = vadd.xlane.f32.xlu0 %v775_v52 }
 0x2ce   :  { %782 = vadd.xlane.f32.xlu0 %v781_v55 }
 0x2d8   :  { %469 = vrot.lane.b32.xlu1 %v1353_v28, %s1265_s18 }
 0x2dc   :  { %473 = vrot.lane.b32.xlu1 %v1358_v29, %s1265_s18 }
 0x2e0   :  { %475 = vrot.lane.b32.xlu1 %v1384_v34, %s1265_s18 }
 0x2e4   :  { %471 = vrot.lane.b32.xlu0 %v1377_v33, %s1265_s18  ;;  %585 = vrot.lane.b32.xlu1 %v1377_v33, %s1266_s27 }
 0x2e8   :  { %583 = vrot.lane.b32.xlu0 %v1353_v28, %s1266_s27  ;;  %589 = vrot.lane.b32.xlu1 %v1384_v34, %s1266_s27 }
 0x2ec   :  { %587 = vrot.lane.b32.xlu0 %v1358_v29, %s1266_s27 }
 0x33d   :  { %v455_v61 = vpop.xlane.xlu1 %454 }
 0x33e   :  { %v465_v8 = vmul.f32 0.00390625, %v455_v61 }
 0x341   :  { %v458_v62 = vpop.xlane.xlu0 %457 }
 0x342   :  { %v466_v25 = vmul.f32 0.00390625, %v458_v62 }
 0x344   :  { %v1186_v39 = vpack.c.bf16 %v466_v25, %v465_v8 }
 0x346   :  { %1187 = vmatprep.subr.bf16.mxu0 %v1186_v39 }
 0x347   :  { %1189 = vmatpush3.bf16.msra.mxu0 %v1186_v39 }
 0x34c   :  { %v461_v7 = vpop.xlane.xlu1 %460 }
 0x34d   :  { %v467_v11 = vmul.f32 0.00390625, %v461_v7 }
 0x350   :  { %v774_v9 = vpop.xlane.xlu1 %773 }
 0x351   :  { %v784_v19 = vmul.f32 0.00390625, %v774_v9 }
 0x353   :  { %v464_v10 = vpop.xlane.xlu0 %463 }
 0x354   :  { %v468_v12 = vmul.f32 0.00390625, %v464_v10  ;;  %v780_v20 = vpop.xlane.xlu1 %779 }
 0x355   :  { %v786_v30 = vmul.f32 0.00390625, %v780_v20 }
 0x356   :  { %v1190_v13 = vpack.c.bf16 %v468_v12, %v467_v11 }
 0x357   :  { %v777_v15 = vpop.xlane.xlu0 %776 }
 0x358   :  { %v785_v27 = vmul.f32 0.00390625, %v777_v15  ;;  %1191 = vmatprep.subr.bf16.mxu0 %v1190_v13  ;;  %v470_v49 = vpop.permute.xlu1 %469 }
 0x359   :  { %1193 = vmatpush3.bf16.msra.mxu0 %v1190_v13 }
 0x35a   :  { %v1202_v23 = vpack.c.bf16 %v785_v27, %v784_v19 }
 0x35b   :  { %v783_v41 = vpop.xlane.xlu0 %782 }
 0x35c   :  { %v787_v63 = vmul.f32 0.00390625, %v783_v41  ;;  %1123 = vmatmul.mubr.msk.f32.vlgmr.msra.gmra.mrb[8].mxu0 %vm481_vm2, %v446_v51  ;;  %1203 = vmatprep.subr.bf16.mxu0 %v1202_v23  ;;  %v474_v52 = vpop.permute.xlu1 %473 }
 0x35d   :  { %1205 = vmatpush3.bf16.msra.mxu0 %v1202_v23  ;;  %1125 = vmatprep.mubr.msk.f32.mxu0 %vm481_vm2, %v447_v24 }
 0x35e   :  { %v1206_v37 = vpack.c.bf16 %v787_v63, %v786_v30  ;;  %v450_v30 = vld [vmem:[%s1727_s3 + $0x28] sm:$0xff] }
 0x35f   :  { %v472_v55 = vpop.permute.xlu0 %471 }
 0x360   :  { %1126 = vmatmul.mubr.msk.f32.gmra.mrb[10].mxu0 %vm481_vm2, %v448_v0  ;;  %1207 = vmatprep.subr.bf16.mxu0 %v1206_v37  ;;  %v476_v25 = vpop.permute.xlu1 %475 }
 0x361   :  { %1209 = vmatpush3.bf16.msra.mxu0 %v1206_v37  ;;  %1150 = vmatprep.mubr.msk.f32.mxu0 %vm481_vm2, %v445_v58  ;;  %v451_v37 = vld [vmem:[%s1727_s3 + $0x30] sm:$0xff] }
 0x364   :  { %1151 = vmatmul.mubr.msk.f32.vlgmr.msra.gmra.mrb[12].mxu0 %vm481_vm2, %v446_v51 }
 0x365   :  { %1153 = vmatprep.mubr.msk.f32.mxu0 %vm481_vm2, %v447_v24 }
 0x368   :  { %1154 = vmatmul.mubr.msk.f32.gmra.mrb[14].mxu0 %vm481_vm2, %v448_v0 }
 0x42f   :  { %v1124_v58 = vpop.f32.mrb[8].mxu0 }
 0x430   :  { %v566_v61 = vadd.f32 %v1124_v58, %v472_v55  ;;  %v560_v62 = vpop.f32.mrb[9].mxu0 }
 0x431   :  { %v561_v8 = vadd.f32 %v560_v62, %v470_v49  ;;  %v584_v62 = vpop.permute.xlu0 %583 }
 0x432   :  { %v580_v39 = vmax.f32 %v566_v61, 0.0 }
 0x433   :  { %v579_v7 = vmax.f32 %v561_v8, 0.0  ;;  %v1127_v9 = vpop.f32.mrb[10].mxu0 }
 0x434   :  { %v576_v10 = vadd.f32 %v1127_v9, %v476_v25  ;;  %v570_v11 = vpop.f32.mrb[11].mxu0 }
 0x435   :  { %v1194_v33 = vpack.c.bf16 %v580_v39, %v579_v7  ;;  %v571_v12 = vadd.f32 %v570_v11, %v474_v52  ;;  %v588_v11 = vpop.permute.xlu0 %587 }
 0x436   :  { %v582_v28 = vmax.f32 %v576_v10, 0.0 }
 0x437   :  { %v581_v13 = vmax.f32 %v571_v12, 0.0  ;;  %1195 = vmatprep.subr.bf16.mxu1 %v1194_v33  ;;  %v1152_v34 = vpop.f32.mrb[12].mxu0 }
 0x438   :  { %v860_v29 = vadd.f32 %v1152_v34, %v472_v55  ;;  %1197 = vmatpush3.bf16.msra.mxu1 %v1194_v33  ;;  %v854_v15 = vpop.f32.mrb[13].mxu0 }
 0x439   :  { %v1198_v19 = vpack.c.bf16 %v582_v28, %v581_v13  ;;  %v855_v27 = vadd.f32 %v854_v15, %v470_v49  ;;  %v452_v49 = vld [vmem:[%s1727_s3 + $0x38] sm:$0xff] }
 0x43a   :  { %v874_v20 = vmax.f32 %v860_v29, 0.0 }
 0x43b   :  { %v873_v51 = vmax.f32 %v855_v27, 0.0  ;;  %1199 = vmatprep.subr.bf16.mxu1 %v1198_v19  ;;  %v1155_v23 = vpop.f32.mrb[14].mxu0 }
 0x43c   :  { %v870_v24 = vadd.f32 %v1155_v23, %v476_v25  ;;  %1201 = vmatpush3.bf16.msra.mxu1 %v1198_v19  ;;  %v864_v41 = vpop.f32.mrb[15].mxu0 }
 0x43d   :  { %v1210_v63 = vpack.c.bf16 %v874_v20, %v873_v51  ;;  %v865_v0 = vadd.f32 %v864_v41, %v474_v52  ;;  %v586_v52 = vpop.permute.xlu1 %585 }
 0x43e   :  { %v876_v55 = vmax.f32 %v870_v24, 0.0 }
 0x43f   :  { %v875_v58 = vmax.f32 %v865_v0, 0.0  ;;  %1137 = vmatmul.mubr.msk.f32.vlgmr.msra.gmra.mrb[8].mxu1 %vm481_vm2, %v450_v30  ;;  %1211 = vmatprep.subr.bf16.mxu1 %v1210_v63 }
 0x440   :  { %1213 = vmatpush3.bf16.msra.mxu1 %v1210_v63  ;;  %1139 = vmatprep.mubr.msk.f32.mxu1 %vm481_vm2, %v451_v37 }
 0x441   :  { %v1214_v61 = vpack.c.bf16 %v876_v55, %v875_v58  ;;  %v590_v9 = vpop.permute.xlu1 %589 }
 0x443   :  { %1140 = vmatmul.mubr.msk.f32.gmra.mrb[10].mxu1 %vm481_vm2, %v452_v49  ;;  %1215 = vmatprep.subr.bf16.mxu1 %v1214_v61 }
 0x444   :  { %1217 = vmatpush3.bf16.msra.mxu1 %v1214_v61  ;;  %1164 = vmatprep.mubr.msk.f32.mxu1 %vm481_vm2, %v449_v4 }
 0x447   :  { %1165 = vmatmul.mubr.msk.f32.vlgmr.msra.gmra.mrb[12].mxu1 %vm481_vm2, %v450_v30 }
 0x448   :  { %1167 = vmatprep.mubr.msk.f32.mxu1 %vm481_vm2, %v451_v37 }
 0x44b   :  { %1168 = vmatmul.mubr.msk.f32.gmra.mrb[14].mxu1 %vm481_vm2, %v452_v49 }
 0x512   :  { %v1138_v8 = vpop.f32.mrb[8].mxu1 }
 0x513   :  { %v679_v25 = vadd.f32 %v1138_v8, %v586_v52  ;;  %v673_v39 = vpop.f32.mrb[9].mxu1 }
 0x514   :  { %v674_v7 = vadd.f32 %v673_v39, %v584_v62 }
 0x515   :  { %v694_v10 = vsel %vm692_vm3, %v679_v25, -inf }
 0x516   :  { %v693_v33 = vsel %vm692_vm3, %v674_v7, -inf  ;;  %v1141_v4 = vpop.f32.mrb[10].mxu1 }
 0x517   :  { %v697_v12 = vmax.f32 %v693_v33, %v694_v10  ;;  %v689_v28 = vadd.f32 %v1141_v4, %v590_v9  ;;  %v683_v13 = vpop.f32.mrb[11].mxu1 }
 0x518   :  { %v684_v34 = vadd.f32 %v683_v13, %v588_v11 }
 0x519   :  { %v696_v29 = vsel %vm692_vm3, %v689_v28, -inf }
 0x51a   :  { %v695_v15 = vsel %vm692_vm3, %v684_v34, -inf  ;;  %v1166_v19 = vpop.f32.mrb[12].mxu1 }
 0x51b   :  { %v698_v27 = vmax.f32 %v695_v15, %v696_v29  ;;  %v949_v20 = vadd.f32 %v1166_v19, %v586_v52  ;;  %v943_v51 = vpop.f32.mrb[13].mxu1 }
 0x51c   :  { %v944_v23 = vadd.f32 %v943_v51, %v584_v62 }
 0x51d   :  { %v699_v24 = vmax.f32 %v697_v12, %v698_v27  ;;  %v963_v41 = vsel %vm692_vm3, %v949_v20, -inf }
 0x51e   :  { %v962_v30 = vsel %vm692_vm3, %v944_v23, -inf  ;;  %v1169_v63 = vpop.f32.mrb[14].mxu1 }
 0x51f   :  { %v700_v0 = vrot.slane %v699_v24, 4  ;;  %v966_v37 = vmax.f32 %v962_v30, %v963_v41  ;;  %v959_v55 = vadd.f32 %v1169_v63, %v590_v9  ;;  %v953_v58 = vpop.f32.mrb[15].mxu1 }
 0x520   :  { %v954_v49 = vadd.f32 %v953_v58, %v588_v11 }
 0x521   :  { %v701_v61 = vmax.f32 %v699_v24, %v700_v0  ;;  %v965_v8 = vsel %vm692_vm3, %v959_v55, -inf }
 0x522   :  { %v964_v39 = vsel %vm692_vm3, %v954_v49, -inf }
 0x523   :  { %v702_v10 = vrot.slane %v701_v61, 2  ;;  %v967_v52 = vmax.f32 %v964_v39, %v965_v8 }
 0x525   :  { %v703_v33 = vmax.f32 %v701_v61, %v702_v10  ;;  %v968_v62 = vmax.f32 %v966_v37, %v967_v52 }
 0x527   :  { %v704_v4 = vrot.slane %v703_v33, 1  ;;  %v969_v12 = vrot.slane %v968_v62, 4 }
 0x529   :  { %v705_v13 = vmax.f32 %v703_v33, %v704_v4  ;;  %v970_v29 = vmax.f32 %v968_v62, %v969_v12 }
 0x52b   :  { %v706_v15 = vsub.f32 %v674_v7, %v705_v13  ;;  %v708_v19 = vsub.f32 %v684_v34, %v705_v13  ;;  %v709_v27 = vsub.f32 %v689_v28, %v705_v13  ;;  %v971_v51 = vrot.slane %v970_v29, 2 }
 0x52c   :  { %v707_v9 = vsub.f32 %v679_v25, %v705_v13 }
 0x52d   :  { %v710_v41 = vmul.f32 1.442695, %v706_v15  ;;  %v714_v11 = vmul.f32 1.442695, %v708_v19  ;;  %v972_v24 = vmax.f32 %v970_v29, %v971_v51  ;;  %v716_v0 = vmul.f32 1.442695, %v709_v27 }
 0x52e   :  { %v712_v30 = vmul.f32 1.442695, %v707_v9 }
 0x52f   :  { %1241 = vpow2.f32 %v710_v41  ;;  %v973_v63 = vrot.slane %v972_v24, 1 }
 0x530   :  { %1243 = vpow2.f32 %v714_v11 }
 0x531   :  { %v974_v58 = vmax.f32 %v972_v24, %v973_v63  ;;  %1245 = vpow2.f32 %v712_v30 }
 0x532   :  { %1247 = vpow2.f32 %v716_v0 }
 0x533   :  { %v976_v37 = vsub.f32 %v949_v20, %v974_v58  ;;  %v977_v61 = vsub.f32 %v954_v49, %v974_v58  ;;  %v978_v8 = vsub.f32 %v959_v55, %v974_v58  ;;  %v975_v39 = vsub.f32 %v944_v23, %v974_v58 }
 0x535   :  { %v981_v7 = vmul.f32 1.442695, %v976_v37  ;;  %v983_v34 = vmul.f32 1.442695, %v977_v61  ;;  %v979_v28 = vmul.f32 1.442695, %v975_v39 }
 0x536   :  { %v985_v25 = vmul.f32 1.442695, %v978_v8 }
 0x537   :  { %1249 = vpow2.f32 %v981_v7 }
 0x538   :  { %1251 = vpow2.f32 %v983_v34 }
 0x539   :  { %v1242_v10 = vpop.eup %1241  ;;  %1253 = vpow2.f32 %v979_v28 }
 0x53a   :  { %v1244_v52 = vpop.eup %1243  ;;  %v718_v33 = vsel %vm692_vm3, %v1242_v10, 0.0  ;;  %1255 = vpow2.f32 %v985_v25 }
 0x53b   :  { %v1246_v62 = vpop.eup %1245  ;;  %v721_v23 = vsel %vm692_vm3, %v1244_v52, 0.0 }
 0x53c   :  { %v719_v4 = vsel %vm692_vm3, %v1246_v62, 0.0  ;;  %v1248_v20 = vpop.eup %1247 }
 0x53d   :  { %v720_v49 = vadd.f32 %v719_v4, %v718_v33  ;;  %v723_v13 = vsel %vm692_vm3, %v1248_v20, 0.0 }
 0x53f   :  { %v722_v55 = vadd.f32 %v721_v23, %v720_v49 }
 0x541   :  { %v1250_v12 = vpop.eup %1249  ;;  %v724_v29 = vadd.f32 %v723_v13, %v722_v55 }
 0x542   :  { %v1252_v15 = vpop.eup %1251  ;;  %v988_v19 = vsel %vm692_vm3, %v1250_v12, 0.0 }
 0x543   :  { %v1254_v27 = vpop.eup %1253  ;;  %v725_v51 = vrot.slane %v724_v29, 4  ;;  %v990_v30 = vsel %vm692_vm3, %v1252_v15, 0.0 }
 0x544   :  { %v987_v9 = vsel %vm692_vm3, %v1254_v27, 0.0  ;;  %v1256_v41 = vpop.eup %1255 }
 0x545   :  { %v726_v11 = vadd.f32 %v725_v51, %v724_v29  ;;  %v989_v24 = vadd.f32 %v988_v19, %v987_v9  ;;  %v992_v58 = vsel %vm692_vm3, %v1256_v41, 0.0 }
 0x547   :  { %v727_v63 = vrot.slane %v726_v11, 2  ;;  %v991_v0 = vadd.f32 %v990_v30, %v989_v24 }
 0x549   :  { %v728_v37 = vadd.f32 %v727_v63, %v726_v11  ;;  %v993_v61 = vadd.f32 %v992_v58, %v991_v0 }
 0x54b   :  { %v729_v8 = vrot.slane %v728_v37, 1  ;;  %v994_v39 = vrot.slane %v993_v61, 4 }
 0x54d   :  { %v730_v7 = vadd.f32 %v729_v8, %v728_v37  ;;  %v995_v34 = vadd.f32 %v994_v39, %v993_v61 }
 0x54f   :  { %1257 = vrcp.f32 %v730_v7  ;;  %v996_v28 = vrot.slane %v995_v34, 2 }
 0x551   :  { %v997_v25 = vadd.f32 %v996_v28, %v995_v34 }
 0x553   :  { %v998_v33 = vrot.slane %v997_v25, 1 }
 0x555   :  { %v999_v4 = vadd.f32 %v998_v33, %v997_v25 }
 0x557   :  { %1259 = vrcp.f32 %v999_v4 }
 0x559   :  { %v1258_v49 = vpop.eup %1257 }
 0x55a   :  { %v733_v23 = vmul.f32 %v1258_v49, %v1246_v62  ;;  %v732_v55 = vmul.f32 %v1258_v49, %v1242_v10  ;;  %v734_v13 = vmul.f32 %v1258_v49, %v1244_v52  ;;  %v735_v29 = vmul.f32 %v1258_v49, %v1248_v20 }
 0x55c   :  { %743 = vperm.xlu1 %1232, %v733_v23   ;;  %738 = vperm.xlu0 %1231, %v732_v55  }
 0x560   :  { %748 = vperm.xlu1 %1232, %v734_v13   ;;  %753 = vperm.xlu0 %1231, %v735_v29  }
 0x561   :  { %v1260_v19 = vpop.eup %1259 }
 0x562   :  { %v1001_v51 = vmul.f32 %v1260_v19, %v1254_v27  ;;  %v1002_v9 = vmul.f32 %v1260_v19, %v1250_v12  ;;  %v1003_v11 = vmul.f32 %v1260_v19, %v1252_v15  ;;  %v1004_v24 = vmul.f32 %v1260_v19, %v1256_v41 }
 0x564   :  { %1007 = vperm.xlu1 %1232, %v1001_v51   ;;  %1012 = vperm.xlu0 %1231, %v1002_v9  }
 0x568   :  { %1017 = vperm.xlu1 %1232, %v1003_v11   ;;  %1022 = vperm.xlu0 %1231, %v1004_v24  }
 0x5db   :  { %v744_v30 = vpop.permute.xlu1 %743  ;;  %v739_v63 = vpop.permute.xlu0 %738 }
 0x5dc   :  { %v758_v10 = vmul.f32 %v744_v30, %v433_v5  ;;  %v759_v52 = vmul.f32 %v744_v30, %v434_v38  ;;  %v756_v62 = vmul.f32 %v739_v63, %v429_v1  ;;  %v757_v20 = vmul.f32 %v739_v63, %v430_v2 }
 0x5de   :  { %766 = vst [vmem:[%s1728_s4 + $0x10] sm:$0xff] %v758_v10  ;;  %767 = vst [vmem:[%s1728_s4 + $0x18] sm:$0xff] %v759_v52 }
 0x5df   :  { %764 = vst [vmem:[%s1728_s4] sm:$0xff] %v756_v62  ;;  %765 = vst [vmem:[%s1728_s4 + $0x8] sm:$0xff] %v757_v20  ;;  %v749_v59 = vpop.permute.xlu1 %748  ;;  %v754_v1 = vpop.permute.xlu0 %753 }
 0x5e0   :  { %v760_v60 = vmul.f32 %v749_v59, %v437_v31  ;;  %v761_v2 = vmul.f32 %v749_v59, %v438_v50  ;;  %v762_v26 = vmul.f32 %v754_v1, %v441_v40  ;;  %v763_v3 = vmul.f32 %v754_v1, %v442_v42 }
 0x5e2   :  { %768 = vst [vmem:[%s1728_s4 + $0x20] sm:$0xff] %v760_v60  ;;  %769 = vst [vmem:[%s1728_s4 + $0x28] sm:$0xff] %v761_v2 }
 0x5e3   :  { %770 = vst [vmem:[%s1728_s4 + $0x30] sm:$0xff] %v762_v26  ;;  %771 = vst [vmem:[%s1728_s4 + $0x38] sm:$0xff] %v763_v3  ;;  %v1008_v5 = vpop.permute.xlu1 %1007  ;;  %v1013_v38 = vpop.permute.xlu0 %1012 }
 0x5e4   :  { %v1025_v16 = vmul.f32 %v1008_v5, %v431_v21  ;;  %v1026_v17 = vmul.f32 %v1008_v5, %v432_v56  ;;  %v1027_v31 = vmul.f32 %v1013_v38, %v435_v46  ;;  %v1028_v50 = vmul.f32 %v1013_v38, %v436_v6 }
 0x5e6   :  { %1074 = vst [vmem:[%s1728_s4 + $0x40] sm:$0xff] %v1025_v16  ;;  %1075 = vst [vmem:[%s1728_s4 + $0x48] sm:$0xff] %v1026_v17 }
 0x5e7   :  { %1076 = vst [vmem:[%s1728_s4 + $0x50] sm:$0xff] %v1027_v31  ;;  %1077 = vst [vmem:[%s1728_s4 + $0x58] sm:$0xff] %v1028_v50  ;;  %v1018_v14 = vpop.permute.xlu1 %1017  ;;  %v1023_v18 = vpop.permute.xlu0 %1022 }
 0x5e8   :  { %v1029_v21 = vmul.f32 %v1018_v14, %v439_v43  ;;  %v1030_v56 = vmul.f32 %v1018_v14, %v440_v45  ;;  %v1031_v32 = vmul.f32 %v1023_v18, %v443_v53  ;;  %v1032_v44 = vmul.f32 %v1023_v18, %v444_v54 }
 0x5ea   :  { %1078 = vst [vmem:[%s1728_s4 + $0x60] sm:$0xff] %v1029_v21  ;;  %1079 = vst [vmem:[%s1728_s4 + $0x68] sm:$0xff] %v1030_v56 }
 0x5eb   :  { %1080 = vst [vmem:[%s1728_s4 + $0x70] sm:$0xff] %v1031_v32  ;;  %1081 = vst [vmem:[%s1728_s4 + $0x78] sm:$0xff] %v1032_v44 }

</bundles_post_ra>
